<compile_context>
chip_gen: v7x
topology: tpu7x:2x2x1
jax: 0.10.0
libtpu: 0.0.40
codegen_flags: <defaults>
</compile_context>

<pallas_src>
import jax
import jax.numpy as jnp
from jax.experimental import pallas as pl
from jax.experimental.pallas import tpu as pltpu

LANE = 128          # vreg lane width
BATCH_ALIGN = 16    # bf16 sublane packing (safe for f32 tiles too)
H_CHUNK = 512       # hidden-dim chunk (lanes) for large hidden layers


def _round_up(n, m):
    return ((n + m - 1) // m) * m


def _vmem_capacity_bytes():
    try:
        return int(pltpu.get_tpu_info().vmem_capacity_bytes)
    except Exception:
        return 64 << 20  # conservative fallback (v7x per-core VMEM)


def _make_kernel(n_chunks, h_chunk, tb, op):
    """Returns (kernel_fn, scratch_shapes). Chunked path only when n_chunks > 1."""
    if n_chunks == 1:
        def kernel(x_ref, w1_ref, b1_ref, w2_ref, b2_ref, o_ref):
            x = x_ref[...].astype(jnp.bfloat16)                      # free VPU cast
            h = jnp.dot(x, w1_ref[...], preferred_element_type=jnp.float32)
            h = jnp.maximum(h + b1_ref[...], 0.0)                    # bias + ReLU in f32
            y = jnp.dot(h.astype(jnp.bfloat16), w2_ref[...],
                        preferred_element_type=jnp.float32)
            y = y + b2_ref[...]
            o_ref[...] = (1.0 / (1.0 + jnp.exp(-y))).astype(o_ref.dtype)  # exact sigmoid (EUP)
        return kernel, []

    def kernel(x_ref, w1_ref, b1_ref, w2_ref, b2_ref, o_ref, acc_ref):
        x = x_ref[...].astype(jnp.bfloat16)
        acc_ref[...] = jnp.zeros_like(acc_ref)
        # Static chunk loop over the hidden dim: never materialize the full (TB, Hp)
        # f32 intermediate, only a (TB, h_chunk) slice plus its bf16 copy.
        for c in range(n_chunks):
            lo = c * h_chunk
            hi = lo + h_chunk
            h = jnp.dot(x, w1_ref[:, lo:hi], preferred_element_type=jnp.float32)
            h = jnp.maximum(h + b1_ref[:, lo:hi], 0.0)
            acc_ref[...] += jnp.dot(h.astype(jnp.bfloat16), w2_ref[lo:hi, :],
                                    preferred_element_type=jnp.float32)
        y = acc_ref[...] + b2_ref[...]
        o_ref[...] = (1.0 / (1.0 + jnp.exp(-y))).astype(o_ref.dtype)
    return kernel, [pltpu.VMEM((tb, op), jnp.float32)]


def prepare_mlp_params(w1, b1, w2, b2):
    """One-time parameter prep (pad feature dims to lane multiples, cast weights bf16).

    Call this once at init time; per-call forwards only touch x.
    Zero padding is numerically exact: padded K columns contribute 0, padded hidden
    columns give relu(0)=0 into fc2, padded output columns are sliced off.
    """
    D_in, H = w1.shape
    D_out = w2.shape[1]

    Dp = _round_up(D_in, LANE)
    Op = _round_up(D_out, LANE)
    if H <= H_CHUNK:
        Hp = _round_up(H, LANE)
        h_chunk = Hp
    else:
        Hp = _round_up(H, H_CHUNK)
        h_chunk = H_CHUNK

    w1p = jnp.pad(w1.astype(jnp.bfloat16), ((0, Dp - D_in), (0, Hp - H)))
    b1p = jnp.pad(b1.astype(jnp.float32), (0, Hp - H)).reshape(1, Hp)
    w2p = jnp.pad(w2.astype(jnp.bfloat16), ((0, Hp - H), (0, Op - D_out)))
    b2p = jnp.pad(b2.astype(jnp.float32), (0, Op - D_out)).reshape(1, Op)

    return {
        "w1": w1p, "b1": b1p, "w2": w2p, "b2": b2p,
        "dims": (D_in, H, D_out), "padded": (Dp, Hp, Op), "h_chunk": h_chunk,
    }


def mlp_forward(x, params, *, block_batch=None):
    """x:(B, D_in) f32, params from prepare_mlp_params(). Returns (B, D_out) f32."""
    D_in, H, D_out = params["dims"]
    Dp, Hp, Op = params["padded"]
    h_chunk = params["h_chunk"]
    n_chunks = Hp // h_chunk
    B = x.shape[0]

    cap = _vmem_capacity_bytes()
    if block_batch is None:
        # 128 MiB parts (v5e/v6e): bigger tiles amortize per-step overhead; v7x (64 MiB): 512.
        block_batch = 1024 if cap >= (96 << 20) else 512

    Bq = _round_up(B, BATCH_ALIGN)
    TB = min(block_batch, Bq)
    # v7x megacore: guarantee >= 2 grid steps whenever the batch is big enough to split,
    # so ("parallel",) actually shards across both TensorCores.
    if Bq >= 2 * BATCH_ALIGN:
        TB = min(TB, _round_up(pl.cdiv(Bq, 2), BATCH_ALIGN))

    def vmem_needed(tb):
        resident = (Dp * Hp + Hp * Op) * 2 + (Hp + Op) * 4              # bf16 weights (single-buffered) + f32 biases
        tiles = 2 * tb * Dp * 4 + 2 * tb * Op * 4                       # double-buffered f32 x / out tiles
        work = tb * Dp * 2 + tb * h_chunk * 6                           # bf16 x copy + f32 h chunk + bf16 h copy
        work += tb * Op * 4 if n_chunks > 1 else 0                      # f32 accumulator scratch
        return resident + tiles + work

    budget = int(0.85 * cap)
    while vmem_needed(TB) > budget and TB > BATCH_ALIGN:
        TB = max(BATCH_ALIGN, _round_up(TB // 2, BATCH_ALIGN))
    # TODO(synk): if the resident weights alone exceed the VMEM budget, fall back to a
    # K/N-tiled (non-resident-weight) schedule with 256-wide tiles on v6e/v7x.

    Bp = _round_up(Bq, TB)

    # Per-call activation prep: keep x f32 (cast to bf16 inside the kernel); pad only if needed.
    x_in = x.astype(jnp.float32)
    if Bp != B or Dp != D_in:
        x_in = jnp.pad(x_in, ((0, Bp - B), (0, Dp - D_in)))

    vmem_limit = int(min(max(int(1.25 * vmem_needed(TB)), 32 << 20), int(0.92 * cap)))

    kernel, scratch = _make_kernel(n_chunks, h_chunk, TB, Op)

    def build(single_buffer_weights):
        resident_kw = dict(pipeline_mode=pl.Buffered(1)) if single_buffer_weights else {}
        in_specs = [
            pl.BlockSpec((TB, Dp), lambda i: (i, 0)),                   # x: streamed over batch tiles
            pl.BlockSpec((Dp, Hp), lambda i: (0, 0), **resident_kw),    # w1: resident in VMEM
            pl.BlockSpec((1, Hp), lambda i: (0, 0), **resident_kw),     # b1: resident
            pl.BlockSpec((Hp, Op), lambda i: (0, 0), **resident_kw),    # w2: resident
            pl.BlockSpec((1, Op), lambda i: (0, 0), **resident_kw),     # b2: resident
        ]
        return pl.pallas_call(
            kernel,
            out_shape=jax.ShapeDtypeStruct((Bp, Op), jnp.float32),
            grid=(Bp // TB,),
            in_specs=in_specs,
            out_specs=pl.BlockSpec((TB, Op), lambda i: (i, 0)),
            scratch_shapes=scratch,
            compiler_params=pltpu.CompilerParams(
                dimension_semantics=("parallel",),      # batch tiles independent -> both TCs on v7x
                vmem_limit_bytes=vmem_limit,
            ),
        )

    args = (x_in, params["w1"], params["b1"], params["w2"], params["b2"])
    try:
        out_p = build(True)(*args)
    except Exception:
        # pipeline_mode=pl.Buffered(1) rejected on this jax version -> default buffering.
        out_p = build(False)(*args)

    return out_p[:B, :D_out]


def _reference(x, w1, b1, w2, b2):
    # Same bf16-on-MXU / f32-accumulate arithmetic as the kernel.
    xb = x.astype(jnp.bfloat16).astype(jnp.float32)
    w1b = w1.astype(jnp.bfloat16).astype(jnp.float32)
    w2b = w2.astype(jnp.bfloat16).astype(jnp.float32)
    h = jnp.maximum(xb @ w1b + b1, 0.0)
    hb = h.astype(jnp.bfloat16).astype(jnp.float32)
    return jax.nn.sigmoid(hb @ w2b + b2)


def _run_case(key, batch, input_dim, hidden_dim, output_dim):
    kx, kw1, kb1, kw2, kb2 = jax.random.split(key, 5)
    x = jax.random.normal(kx, (batch, input_dim), dtype=jnp.float32)
    lim1 = 1.0 / (input_dim ** 0.5)
    w1 = jax.random.uniform(kw1, (input_dim, hidden_dim), minval=-lim1, maxval=lim1, dtype=jnp.float32)
    b1 = jax.random.uniform(kb1, (hidden_dim,), minval=-lim1, maxval=lim1, dtype=jnp.float32)
    lim2 = 1.0 / (hidden_dim ** 0.5)
    w2 = jax.random.uniform(kw2, (hidden_dim, output_dim), minval=-lim2, maxval=lim2, dtype=jnp.float32)
    b2 = jax.random.uniform(kb2, (output_dim,), minval=-lim2, maxval=lim2, dtype=jnp.float32)

    params = prepare_mlp_params(w1, b1, w2, b2)       # one-time weight prep
    out = jax.block_until_ready(mlp_forward(x, params))
    ref = _reference(x, w1, b1, w2, b2)

    assert out.shape == (batch, output_dim)
    err = float(jnp.max(jnp.abs(out - ref)))
    assert jnp.allclose(out, ref, atol=2e-3, rtol=2e-3), f"mismatch vs reference, max abs err = {err}"


if __name__ == "__main__":
    # Shapes implied by MLP(input_dim, hidden_dim, output_dim).
    key = jax.random.PRNGKey(0)
    k1, k2 = jax.random.split(key)

    # Small fused-path case (single hidden chunk).
    _run_case(k1, batch=8, input_dim=32, hidden_dim=64, output_dim=16)
    # Larger hidden dim exercises the chunked-H accumulator path.
    _run_case(k2, batch=8, input_dim=256, hidden_dim=1024, output_dim=128)

    print("KERNEL_OK")
</pallas_src>

<mosaic_0001>
module attributes {stable_mosaic.version = 11 : i64} {
  func.func @kernel(%arg0: i32, %arg1: memref<16x128xf32, #tpu.memory_space<vmem>>, %arg2: memref<128x128xbf16, #tpu.memory_space<vmem>>, %arg3: memref<1x128xf32, #tpu.memory_space<vmem>>, %arg4: memref<128x128xbf16, #tpu.memory_space<vmem>>, %arg5: memref<1x128xf32, #tpu.memory_space<vmem>>, %arg6: memref<16x128xf32, #tpu.memory_space<vmem>>) attributes {dimension_semantics = [#tpu.dimension_semantics<parallel>], iteration_bounds = array<i64: 1>, scalar_prefetch = 0 : i64, scratch_operands = 0 : i64, tpu.core_type = #tpu.core_type<tc>, window_params = [{transform_indices = @transform_0, window_bounds = array<i64: 16, 128>}, {pipeline_mode = #tpu.pipeline_mode<synchronous>, transform_indices = @transform_1, window_bounds = array<i64: 128, 128>}, {pipeline_mode = #tpu.pipeline_mode<synchronous>, transform_indices = @transform_2, window_bounds = array<i64: 1, 128>}, {pipeline_mode = #tpu.pipeline_mode<synchronous>, transform_indices = @transform_3, window_bounds = array<i64: 128, 128>}, {pipeline_mode = #tpu.pipeline_mode<synchronous>, transform_indices = @transform_4, window_bounds = array<i64: 1, 128>}, {transform_indices = @transform_5, window_bounds = array<i64: 16, 128>}]} {
    %c0 = arith.constant 0 : index
    %c0_0 = arith.constant 0 : index
    %0 = vector.load %arg1[%c0, %c0_0] : memref<16x128xf32, #tpu.memory_space<vmem>>, vector<16x128xf32>
    %1 = arith.truncf %0 : vector<16x128xf32> to vector<16x128xbf16>
    %c0_1 = arith.constant 0 : index
    %c0_2 = arith.constant 0 : index
    %2 = vector.load %arg2[%c0_1, %c0_2] : memref<128x128xbf16, #tpu.memory_space<vmem>>, vector<128x128xbf16>
    %cst = arith.constant dense<0.000000e+00> : vector<16x128xf32>
    %3 = tpu.matmul %1, %2, %cst {dimension_numbers = #tpu.dot_dimension_numbers<[1], [0], [0], [1], [0, 0, 1, 1], [], []>} : vector<16x128xbf16>, vector<128x128xbf16>, vector<16x128xf32> -> vector<16x128xf32>
    %c0_3 = arith.constant 0 : index
    %c0_4 = arith.constant 0 : index
    %4 = vector.load %arg3[%c0_3, %c0_4] : memref<1x128xf32, #tpu.memory_space<vmem>>, vector<1x128xf32>
    %5 = vector.broadcast %4 : vector<1x128xf32> to vector<16x128xf32>
    %6 = arith.addf %3, %5 : vector<16x128xf32>
    %cst_5 = arith.constant 0.000000e+00 : f32
    %7 = vector.broadcast %cst_5 : f32 to vector<16x128xf32>
    %8 = arith.maximumf %6, %7 : vector<16x128xf32>
    %9 = arith.truncf %8 : vector<16x128xf32> to vector<16x128xbf16>
    %c0_6 = arith.constant 0 : index
    %c0_7 = arith.constant 0 : index
    %10 = vector.load %arg4[%c0_6, %c0_7] : memref<128x128xbf16, #tpu.memory_space<vmem>>, vector<128x128xbf16>
    %cst_8 = arith.constant dense<0.000000e+00> : vector<16x128xf32>
    %11 = tpu.matmul %9, %10, %cst_8 {dimension_numbers = #tpu.dot_dimension_numbers<[1], [0], [0], [1], [0, 0, 1, 1], [], []>} : vector<16x128xbf16>, vector<128x128xbf16>, vector<16x128xf32> -> vector<16x128xf32>
    %c0_9 = arith.constant 0 : index
    %c0_10 = arith.constant 0 : index
    %12 = vector.load %arg5[%c0_9, %c0_10] : memref<1x128xf32, #tpu.memory_space<vmem>>, vector<1x128xf32>
    %13 = vector.broadcast %12 : vector<1x128xf32> to vector<16x128xf32>
    %14 = arith.addf %11, %13 : vector<16x128xf32>
    %cst_11 = arith.constant 0.000000e+00 : f32
    %15 = vector.broadcast %cst_11 : f32 to vector<16x128xf32>
    %16 = arith.subf %15, %14 : vector<16x128xf32>
    %17 = math.exp %16 : vector<16x128xf32>
    %cst_12 = arith.constant 1.000000e+00 : f32
    %18 = vector.broadcast %cst_12 : f32 to vector<16x128xf32>
    %19 = arith.addf %18, %17 : vector<16x128xf32>
    %cst_13 = arith.constant 1.000000e+00 : f32
    %20 = vector.broadcast %cst_13 : f32 to vector<16x128xf32>
    %21 = arith.divf %20, %19 : vector<16x128xf32>
    %c0_14 = arith.constant 0 : index
    %c0_15 = arith.constant 0 : index
    %22 = vector.load %arg6[%c0_14, %c0_15] : memref<16x128xf32, #tpu.memory_space<vmem>>, vector<16x128xf32>
    tpu.vector_store %arg6[%c0_14, %c0_15], %21 {strides = array<i32>} : memref<16x128xf32, #tpu.memory_space<vmem>>, vector<16x128xf32>,
    return
  }
  func.func @transform_0(%arg0: i32) -> (i32, i32) {
    %c0_i32 = arith.constant 0 : i32
    %c0_i32_0 = arith.constant 0 : i32
    return %arg0, %c0_i32 : i32, i32
  }
  func.func @transform_1(%arg0: i32) -> (i32, i32) {
    %c0_i32 = arith.constant 0 : i32
    %c0_i32_0 = arith.constant 0 : i32
    %c0_i32_1 = arith.constant 0 : i32
    return %c0_i32, %c0_i32_0 : i32, i32
  }
  func.func @transform_2(%arg0: i32) -> (i32, i32) {
    %c0_i32 = arith.constant 0 : i32
    %c0_i32_0 = arith.constant 0 : i32
    %c0_i32_1 = arith.constant 0 : i32
    return %c0_i32, %c0_i32_0 : i32, i32
  }
  func.func @transform_3(%arg0: i32) -> (i32, i32) {
    %c0_i32 = arith.constant 0 : i32
    %c0_i32_0 = arith.constant 0 : i32
    %c0_i32_1 = arith.constant 0 : i32
    return %c0_i32, %c0_i32_0 : i32, i32
  }
  func.func @transform_4(%arg0: i32) -> (i32, i32) {
    %c0_i32 = arith.constant 0 : i32
    %c0_i32_0 = arith.constant 0 : i32
    %c0_i32_1 = arith.constant 0 : i32
    return %c0_i32, %c0_i32_0 : i32, i32
  }
  func.func @transform_5(%arg0: i32) -> (i32, i32) {
    %c0_i32 = arith.constant 0 : i32
    %c0_i32_0 = arith.constant 0 : i32
    return %arg0, %c0_i32 : i32, i32
  }
}

module attributes {stable_mosaic.version = 11 : i64} {
  func.func @kernel(%arg0: i32, %arg1: memref<16x128xf32, #tpu.memory_space<vmem>>, %arg2: memref<128x128xbf16, #tpu.memory_space<vmem>>, %arg3: memref<1x128xf32, #tpu.memory_space<vmem>>, %arg4: memref<128x128xbf16, #tpu.memory_space<vmem>>, %arg5: memref<1x128xf32, #tpu.memory_space<vmem>>, %arg6: memref<16x128xf32, #tpu.memory_space<vmem>>) attributes {dimension_semantics = [#tpu.dimension_semantics<parallel>], iteration_bounds = array<i64: 1>, scalar_prefetch = 0 : i64, scratch_operands = 0 : i64, tpu.core_type = #tpu.core_type<tc>, window_params = [{transform_indices = @transform_0, window_bounds = array<i64: 16, 128>}, {pipeline_mode = #tpu.pipeline_mode<synchronous>, transform_indices = @transform_1, window_bounds = array<i64: 128, 128>}, {pipeline_mode = #tpu.pipeline_mode<synchronous>, transform_indices = @transform_2, window_bounds = array<i64: 1, 128>}, {pipeline_mode = #tpu.pipeline_mode<synchronous>, transform_indices = @transform_3, window_bounds = array<i64: 128, 128>}, {pipeline_mode = #tpu.pipeline_mode<synchronous>, transform_indices = @transform_4, window_bounds = array<i64: 1, 128>}, {transform_indices = @transform_5, window_bounds = array<i64: 16, 128>}]} {
    %c0 = arith.constant 0 : index
    %c0_0 = arith.constant 0 : index
    %0 = vector.load %arg1[%c0, %c0_0] : memref<16x128xf32, #tpu.memory_space<vmem>>, vector<16x128xf32>
    %1 = arith.truncf %0 : vector<16x128xf32> to vector<16x128xbf16>
    %c0_1 = arith.constant 0 : index
    %c0_2 = arith.constant 0 : index
    %2 = vector.load %arg2[%c0_1, %c0_2] : memref<128x128xbf16, #tpu.memory_space<vmem>>, vector<128x128xbf16>
    %cst = arith.constant dense<0.000000e+00> : vector<16x128xf32>
    %3 = tpu.matmul %1, %2, %cst {dimension_numbers = #tpu.dot_dimension_numbers<[1], [0], [0], [1], [0, 0, 1, 1], [], []>} : vector<16x128xbf16>, vector<128x128xbf16>, vector<16x128xf32> -> vector<16x128xf32>
    %c0_3 = arith.constant 0 : index
    %c0_4 = arith.constant 0 : index
    %4 = vector.load %arg3[%c0_3, %c0_4] : memref<1x128xf32, #tpu.memory_space<vmem>>, vector<1x128xf32>
    %5 = vector.broadcast %4 : vector<1x128xf32> to vector<16x128xf32>
    %6 = arith.addf %3, %5 : vector<16x128xf32>
    %cst_5 = arith.constant 0.000000e+00 : f32
    %7 = vector.broadcast %cst_5 : f32 to vector<16x128xf32>
    %8 = arith.maximumf %6, %7 : vector<16x128xf32>
    %9 = arith.truncf %8 : vector<16x128xf32> to vector<16x128xbf16>
    %c0_6 = arith.constant 0 : index
    %c0_7 = arith.constant 0 : index
    %10 = vector.load %arg4[%c0_6, %c0_7] : memref<128x128xbf16, #tpu.memory_space<vmem>>, vector<128x128xbf16>
    %cst_8 = arith.constant dense<0.000000e+00> : vector<16x128xf32>
    %11 = tpu.matmul %9, %10, %cst_8 {dimension_numbers = #tpu.dot_dimension_numbers<[1], [0], [0], [1], [0, 0, 1, 1], [], []>} : vector<16x128xbf16>, vector<128x128xbf16>, vector<16x128xf32> -> vector<16x128xf32>
    %c0_9 = arith.constant 0 : index
    %c0_10 = arith.constant 0 : index
    %12 = vector.load %arg5[%c0_9, %c0_10] : memref<1x128xf32, #tpu.memory_space<vmem>>, vector<1x128xf32>
    %13 = vector.broadcast %12 : vector<1x128xf32> to vector<16x128xf32>
    %14 = arith.addf %11, %13 : vector<16x128xf32>
    %cst_11 = arith.constant 0.000000e+00 : f32
    %15 = vector.broadcast %cst_11 : f32 to vector<16x128xf32>
    %16 = arith.subf %15, %14 : vector<16x128xf32>
    %17 = math.exp %16 : vector<16x128xf32>
    %cst_12 = arith.constant 1.000000e+00 : f32
    %18 = vector.broadcast %cst_12 : f32 to vector<16x128xf32>
    %19 = arith.addf %18, %17 : vector<16x128xf32>
    %cst_13 = arith.constant 1.000000e+00 : f32
    %20 = vector.broadcast %cst_13 : f32 to vector<16x128xf32>
    %21 = arith.divf %20, %19 : vector<16x128xf32>
    %c0_14 = arith.constant 0 : index
    %c0_15 = arith.constant 0 : index
    %22 = vector.load %arg6[%c0_14, %c0_15] : memref<16x128xf32, #tpu.memory_space<vmem>>, vector<16x128xf32>
    tpu.vector_store %arg6[%c0_14, %c0_15], %21 {strides = array<i32>} : memref<16x128xf32, #tpu.memory_space<vmem>>, vector<16x128xf32>,
    return
  }
  func.func @transform_0(%arg0: i32) -> (i32, i32) {
    %c0_i32 = arith.constant 0 : i32
    %c0_i32_0 = arith.constant 0 : i32
    return %arg0, %c0_i32 : i32, i32
  }
  func.func @transform_1(%arg0: i32) -> (i32, i32) {
    %c0_i32 = arith.constant 0 : i32
    %c0_i32_0 = arith.constant 0 : i32
    %c0_i32_1 = arith.constant 0 : i32
    return %c0_i32, %c0_i32_0 : i32, i32
  }
  func.func @transform_2(%arg0: i32) -> (i32, i32) {
    %c0_i32 = arith.constant 0 : i32
    %c0_i32_0 = arith.constant 0 : i32
    %c0_i32_1 = arith.constant 0 : i32
    return %c0_i32, %c0_i32_0 : i32, i32
  }
  func.func @transform_3(%arg0: i32) -> (i32, i32) {
    %c0_i32 = arith.constant 0 : i32
    %c0_i32_0 = arith.constant 0 : i32
    %c0_i32_1 = arith.constant 0 : i32
    return %c0_i32, %c0_i32_0 : i32, i32
  }
  func.func @transform_4(%arg0: i32) -> (i32, i32) {
    %c0_i32 = arith.constant 0 : i32
    %c0_i32_0 = arith.constant 0 : i32
    %c0_i32_1 = arith.constant 0 : i32
    return %c0_i32, %c0_i32_0 : i32, i32
  }
  func.func @transform_5(%arg0: i32) -> (i32, i32) {
    %c0_i32 = arith.constant 0 : i32
    %c0_i32_0 = arith.constant 0 : i32
    return %arg0, %c0_i32 : i32, i32
  }
}

</mosaic_0001>

<bundles_post_ra>
// kernel: tpu_custom_call.1
= control target key start
LH: loop header
LB: loop body
LE: loop exit
PB: predicated region body
PF: predicated region fallthrough
CT: control target
= control target key end

     0   :  { %10 = vsyncpa [#allocation3], 0  ;;  %s635_s0 = inlined_call_operand.hbm [shape: f32[16,128], index: 0, kind: input, shape index: {}]   ;;  %s636_s1 = inlined_call_operand.hbm [shape: bf16[128,128], index: 1, kind: input, shape index: {}]   ;;  %s637_s2 = inlined_call_operand.vmem [shape: f32[1,128], index: 2, kind: input, shape index: {}]   ;;  %s638_s3 = inlined_call_operand.hbm [shape: bf16[128,128], index: 3, kind: input, shape index: {}]   ;;  %s639_s4 = inlined_call_operand.vmem [shape: f32[1,128], index: 4, kind: input, shape index: {}]   ;;  %s640_s5 = inlined_call_operand.hbm [shape: f32[16,128], index: 5, kind: output, shape index: {}]  }
   0x1   :  { %11 = vsyncpa [#allocation6], 0 }
   0x2   :  { %12 = vsyncpa [#allocation4], 0  ;;  %s529_s18 = smov [#allocation5]   ;;  %s435_s22 = scalar_lea.hbm %s636_s1, 1024 }
   0x3   :  { %s30_s19 = sshll.u32 %s529_s18, 4  ;;  %p436_p0 = scmp.ne.s32.totalorder %s636_s1, %s435_s22  ;;  %s31_s19 = int_to_ptr.vmem [resolvable:$true] %s30_s19 }
   0x4   :  { %p439_p1 = scmp.lt.u32.totalorder %s435_s22, %s636_s1 }
   0x6   :  { %p441_p2 = pnand %p439_p1, %p436_p0 }
   0x8   :  { %444 = shalt.err (!%p441_p2)
}
   0x9   :  { %s445_s27 = scalar_lea.vmem %s31_s19, 1024  ;;  %p450_p4 = scmp.lt.s32.totalorder %s31_s19, %s31_s19 }
   0xa   :  { %p446_p3 = scmp.ne.s32.totalorder %s31_s19, %s445_s27  ;;  %p451_p5 = scmp.lt.s32.totalorder %s445_s27, %s445_s27 }
   0xc   :  { %p452_p6 = por %p451_p5, %p450_p4 }
   0xe   :  { %p453_p7 = pnand %p452_p6, %p446_p3 }
  0x10   :  { %456 = shalt.err (!%p453_p7)
}
  0x11   :  { %s530_s28 = smov 64   ;;  %s531_s29 = smov 4  }
  0x12   :  { %36 = dma.hbm_to_vmem [thread:$0]  %s636_s1, 1024, %s31_s19, [#allocation6], %s530_s28, %s530_s28, %s531_s29  }
  0x13   :  { %s532_s7 = smov [#allocation2]   ;;  %s457_s11 = scalar_lea.hbm %s635_s0, 256 }
  0x14   :  { %s18_s8 = sshll.u32 %s532_s7, 4  ;;  %p458_p8 = scmp.ne.s32.totalorder %s635_s0, %s457_s11  ;;  %s19_s8 = int_to_ptr.vmem [resolvable:$true] %s18_s8 }
  0x15   :  { %p461_p9 = scmp.lt.u32.totalorder %s457_s11, %s635_s0 }
  0x17   :  { %p463_p10 = pnand %p461_p9, %p458_p8 }
  0x19   :  { %466 = shalt.err (!%p463_p10)
}
  0x1a   :  { %s467_s16 = scalar_lea.vmem %s19_s8, 256  ;;  %p472_p12 = scmp.lt.s32.totalorder %s19_s8, %s19_s8 }
  0x1b   :  { %p468_p11 = scmp.ne.s32.totalorder %s19_s8, %s467_s16  ;;  %p473_p13 = scmp.lt.s32.totalorder %s467_s16, %s467_s16 }
  0x1d   :  { %p474_p0 = por %p473_p13, %p472_p12 }
  0x1f   :  { %p475_p1 = pnand %p474_p0, %p468_p11 }
  0x21   :  { %478 = shalt.err (!%p475_p1)
}
  0x22   :  { %s533_s1 = smov 128   ;;  %s534_s17 = smov 8  }
  0x23   :  { %24 = dma.hbm_to_vmem [thread:$0]  %s635_s0, 256, %s19_s8, [#allocation3], %s533_s1, %s533_s1, %s534_s17  }
  0x24   :  { %s535_s20 = smov [#allocation7]   ;;  %s479_s24 = scalar_lea.hbm %s638_s3, 1024 }
  0x25   :  { %s44_s21 = sshll.u32 %s535_s20, 4  ;;  %p480_p2 = scmp.ne.s32.totalorder %s638_s3, %s479_s24  ;;  %s45_s21 = int_to_ptr.vmem [resolvable:$true] %s44_s21 }
  0x26   :  { %p483_p3 = scmp.lt.u32.totalorder %s479_s24, %s638_s3 }
  0x28   :  { %p485_p4 = pnand %p483_p3, %p480_p2 }
  0x2a   :  { %488 = shalt.err (!%p485_p4)
}
  0x2b   :  { %s489_s6 = scalar_lea.vmem %s45_s21, 1024  ;;  %p494_p6 = scmp.lt.s32.totalorder %s45_s21, %s45_s21 }
  0x2c   :  { %p490_p5 = scmp.ne.s32.totalorder %s45_s21, %s489_s6  ;;  %p495_p7 = scmp.lt.s32.totalorder %s489_s6, %s489_s6 }
  0x2e   :  { %p496_p8 = por %p495_p7, %p494_p6 }
  0x30   :  { %p497_p9 = pnand %p496_p8, %p490_p5 }
  0x32   :  { %500 = shalt.err (!%p497_p9)
}
  0x33   :  { %50 = dma.hbm_to_vmem [thread:$0]  %s638_s3, 1024, %s45_s21, [#allocation6], %s530_s28, %s530_s28, %s531_s29  }
  0x34   :  { %523 = dma.done.wait [#allocation3], 256  }
  0x35   :  { %524 = vsyncadd [#allocation3], 4294967040 }
  0x36   :  { %525 = dma.done.wait [#allocation6], 2048  }
  0x37   :  { %526 = vsyncadd [#allocation6], 4294965248  ;;  %v536_v0 = vmov 0.0   ;;  %vm537_vm0 = vmmov 0   ;;  %v411_v1 = vld [vmem:[#allocation5] sm:$0xff]   ;;  %v412_v2 = vld [vmem:[#allocation5 + $0x8] sm:$0xff]  }
  0x38   :  { %361 = vmatprep.subr.bf16.mxu0 %v536_v0  ;;  %377 = vmatprep.mubr.msk.bf16.mxu0 %vm537_vm0, %v536_v0  ;;  %v413_v3 = vld [vmem:[#allocation5 + $0x10] sm:$0xff]   ;;  %v419_v4 = vld [vmem:[#allocation7] sm:$0xff]   ;;  %v414_v5 = vld [vmem:[#allocation5 + $0x18] sm:$0xff]  }
  0x39   :  { %381 = vmatprep.subr.bf16.mxu1 %v536_v0  ;;  %397 = vmatprep.mubr.msk.bf16.mxu1 %vm537_vm0, %v536_v0  ;;  %v420_v6 = vld [vmem:[#allocation7 + $0x8] sm:$0xff]   ;;  %v415_v7 = vld [vmem:[#allocation5 + $0x20] sm:$0xff]   ;;  %v421_v8 = vld [vmem:[#allocation7 + $0x10] sm:$0xff]  }
  0x3a   :  { %362 = vmatpush3.bf16.msra.mxu0 %v411_v1  ;;  %382 = vmatpush3.bf16.msra.mxu1 %v419_v4  ;;  %v416_v9 = vld [vmem:[#allocation5 + $0x28] sm:$0xff]   ;;  %v422_v10 = vld [vmem:[#allocation7 + $0x18] sm:$0xff]   ;;  %v417_v11 = vld [vmem:[#allocation5 + $0x30] sm:$0xff]  }
  0x3b   :  { %363 = vmatprep.subr.bf16.mxu0 %v536_v0  ;;  %383 = vmatprep.subr.bf16.mxu1 %v536_v0  ;;  %v423_v12 = vld [vmem:[#allocation7 + $0x20] sm:$0xff]   ;;  %v418_v13 = vld [vmem:[#allocation5 + $0x38] sm:$0xff]   ;;  %v63_v14 = vld [vmem:[#allocation2] sm:$0xff] }
  0x3c   :  { %v64_v15 = vld [vmem:[#allocation2 + $0x8] sm:$0xff]  ;;  %v424_v16 = vld [vmem:[#allocation7 + $0x28] sm:$0xff]   ;;  %v425_v18 = vld [vmem:[#allocation7 + $0x30] sm:$0xff]  }
  0x3d   :  { %v65_v17 = vpack.c.bf16 %v64_v15, %v63_v14  ;;  %v426_v19 = vld [vmem:[#allocation7 + $0x38] sm:$0xff]   ;;  %v325_v20 = vld [vmem:[%s637_s2] ss:$0 sm:$0xff]  ;;  %s538_s2 = smov [#allocation8]  }
  0x3e   :  { %364 = vmatpush3.bf16.msra.mxu0 %v412_v2  ;;  %384 = vmatpush3.bf16.msra.mxu1 %v420_v6  ;;  %v334_v30 = vld [vmem:[%s639_s4] ss:$0 sm:$0xff]  ;;  %s312_s4 = sshll.u32 %s538_s2, 4  ;;  %s313_s4 = int_to_ptr.vmem [resolvable:$true] %s312_s4 }
  0x3f   :  { %365 = vmatprep.subr.bf16.mxu0 %v536_v0  ;;  %385 = vmatprep.subr.bf16.mxu1 %v536_v0  ;;  %s501_s9 = scalar_lea.vmem %s313_s4, 256  ;;  %p506_p11 = scmp.lt.s32.totalorder %s313_s4, %s313_s4 }
  0x40   :  { %p502_p10 = scmp.ne.s32.totalorder %s313_s4, %s501_s9  ;;  %p507_p12 = scmp.lt.s32.totalorder %s501_s9, %s501_s9 }
  0x42   :  { %366 = vmatpush3.bf16.msra.mxu0 %v413_v3  ;;  %386 = vmatpush3.bf16.msra.mxu1 %v421_v8  ;;  %p508_p13 = por %p507_p12, %p506_p11 }
  0x43   :  { %367 = vmatprep.subr.bf16.mxu0 %v536_v0  ;;  %387 = vmatprep.subr.bf16.mxu1 %v536_v0 }
  0x44   :  { %p509_p0 = pnand %p508_p13, %p502_p10 }
  0x46   :  { %368 = vmatpush3.bf16.msra.mxu0 %v414_v5  ;;  %388 = vmatpush3.bf16.msra.mxu1 %v422_v10 }
  0x47   :  { %369 = vmatprep.subr.bf16.mxu0 %v536_v0  ;;  %389 = vmatprep.subr.bf16.mxu1 %v536_v0 }
  0x4a   :  { %370 = vmatpush3.bf16.msra.mxu0 %v415_v7  ;;  %390 = vmatpush3.bf16.msra.mxu1 %v423_v12 }
  0x4b   :  { %371 = vmatprep.subr.bf16.mxu0 %v536_v0  ;;  %391 = vmatprep.subr.bf16.mxu1 %v536_v0 }
  0x4e   :  { %372 = vmatpush3.bf16.msra.mxu0 %v416_v9  ;;  %392 = vmatpush3.bf16.msra.mxu1 %v424_v16 }
  0x4f   :  { %373 = vmatprep.subr.bf16.mxu0 %v536_v0  ;;  %393 = vmatprep.subr.bf16.mxu1 %v536_v0 }
  0x52   :  { %374 = vmatpush3.bf16.msra.mxu0 %v417_v11  ;;  %394 = vmatpush3.bf16.msra.mxu1 %v425_v18 }
  0x53   :  { %375 = vmatprep.subr.bf16.mxu0 %v536_v0  ;;  %395 = vmatprep.subr.bf16.mxu1 %v536_v0 }
  0x56   :  { %376 = vmatpush3.bf16.msra.mxu0 %v418_v13  ;;  %396 = vmatpush3.bf16.msra.mxu1 %v426_v19 }
  0x59   :  { %378 = vmatmul.mubr.bf16.vlgmr.msra.gmra.mrb[0].mxu0 %v65_v17 }
 0x12c   :  { %v171_v21 = vpop.f32.mrb[0].mxu0 }
 0x12d   :  { %v172_v22 = vadd.f32 %v325_v20, %v171_v21  ;;  %v379_v23 = vpop.f32.mrb[1].mxu0 }
 0x12e   :  { %v174_v24 = vpop.f32.mrb[2].mxu0 }
 0x12f   :  { %v175_v25 = vadd.f32 %v325_v20, %v174_v24  ;;  %v380_v26 = vpop.f32.mrb[3].mxu0  ;;  %v178_v27 = vmax.f32 %v172_v22, 0.0 }
 0x131   :  { %v179_v28 = vmax.f32 %v175_v25, 0.0 }
 0x133   :  { %v180_v29 = vpack.c.bf16 %v179_v28, %v178_v27 }
 0x135   :  { %398 = vmatmul.mubr.bf16.vlgmr.msra.gmra.mrb[0].mxu1 %v180_v29 }
 0x208   :  { %v286_v31 = vpop.f32.mrb[0].mxu1 }
 0x209   :  { %v287_v32 = vadd.f32 %v334_v30, %v286_v31  ;;  %v399_v33 = vpop.f32.mrb[1].mxu1 }
 0x20a   :  { %v289_v34 = vpop.f32.mrb[2].mxu1 }
 0x20b   :  { %v293_v35 = vsub.f32 0.0, %v287_v32  ;;  %v290_v36 = vadd.f32 %v334_v30, %v289_v34  ;;  %v400_v37 = vpop.f32.mrb[3].mxu1 }
 0x20d   :  { %v295_v38 = vmul.f32 1.442695, %v293_v35  ;;  %v294_v39 = vsub.f32 0.0, %v290_v36 }
 0x20f   :  { %427 = vpow2.f32 %v295_v38  ;;  %v297_v40 = vmul.f32 1.442695, %v294_v39 }
 0x211   :  { %429 = vpow2.f32 %v297_v40 }
 0x219   :  { %v428_v41 = vpop.eup %427 }
 0x21a   :  { %v299_v42 = vadd.f32 1.0, %v428_v41 }
 0x21b   :  { %v430_v43 = vpop.eup %429 }
 0x21c   :  { %431 = vrcp.f32 %v299_v42  ;;  %v300_v44 = vadd.f32 1.0, %v430_v43 }
 0x21e   :  { %433 = vrcp.f32 %v300_v44 }
 0x226   :  { %v432_v45 = vpop.eup %431 }
 0x227   :  { %305 = vst [vmem:[#allocation8] sm:$0xff] %v432_v45 }
 0x228   :  { %v434_v46 = vpop.eup %433 }
 0x229   :  { %306 = vst [vmem:[#allocation8 + $0x8] sm:$0xff] %v434_v46 }
 0x22a   :  { %512 = shalt.err (!%p509_p0)
}
 0x22b   :  { %s513_s12 = scalar_lea.hbm %s640_s5, 256 }
 0x22c   :  { %p514_p1 = scmp.ne.s32.totalorder %s640_s5, %s513_s12  ;;  %p517_p2 = scmp.lt.u32.totalorder %s513_s12, %s640_s5 }
 0x22e   :  { %p519_p3 = pnand %p517_p2, %p514_p1 }
 0x230   :  { %522 = shalt.err (!%p519_p3)
}
 0x231   :  { %318 = dma.vmem_to_hbm [thread:$0]  %s313_s4, 256, %s640_s5, [#allocation4], %s533_s1, %s533_s1, %s534_s17  }
 0x232   :  { %527 = dma.done.wait [#allocation4], 256  }
 0x233   :  { %528 = vsyncadd [#allocation4], 4294967040 }
 0x234   :  { %322 = vsyncpa [#allocation3], 1 }
 0x235   :  { %323 = vsyncpa [#allocation6], 1 }
 0x236   :  { %324 = vsyncpa [#allocation4], 1 }

// kernel: tpu_custom_call.1
= control target key start
LH: loop header
LB: loop body
LE: loop exit
PB: predicated region body
PF: predicated region fallthrough
CT: control target
= control target key end

     0   :  { %10 = vsyncpa [#allocation3], 0  ;;  %s635_s0 = inlined_call_operand.hbm [shape: f32[16,128], index: 0, kind: input, shape index: {}]   ;;  %s636_s1 = inlined_call_operand.hbm [shape: bf16[128,128], index: 1, kind: input, shape index: {}]   ;;  %s637_s2 = inlined_call_operand.vmem [shape: f32[1,128], index: 2, kind: input, shape index: {}]   ;;  %s638_s3 = inlined_call_operand.hbm [shape: bf16[128,128], index: 3, kind: input, shape index: {}]   ;;  %s639_s4 = inlined_call_operand.vmem [shape: f32[1,128], index: 4, kind: input, shape index: {}]   ;;  %s640_s5 = inlined_call_operand.hbm [shape: f32[16,128], index: 5, kind: output, shape index: {}]  }
   0x1   :  { %11 = vsyncpa [#allocation6], 0 }
   0x2   :  { %12 = vsyncpa [#allocation4], 0  ;;  %s529_s18 = smov [#allocation5]   ;;  %s435_s22 = scalar_lea.hbm %s636_s1, 1024 }
   0x3   :  { %s30_s19 = sshll.u32 %s529_s18, 4  ;;  %p436_p0 = scmp.ne.s32.totalorder %s636_s1, %s435_s22  ;;  %s31_s19 = int_to_ptr.vmem [resolvable:$true] %s30_s19 }
   0x4   :  { %p439_p1 = scmp.lt.u32.totalorder %s435_s22, %s636_s1 }
   0x6   :  { %p441_p2 = pnand %p439_p1, %p436_p0 }
   0x8   :  { %444 = shalt.err (!%p441_p2)
}
   0x9   :  { %s445_s27 = scalar_lea.vmem %s31_s19, 1024  ;;  %p450_p4 = scmp.lt.s32.totalorder %s31_s19, %s31_s19 }
   0xa   :  { %p446_p3 = scmp.ne.s32.totalorder %s31_s19, %s445_s27  ;;  %p451_p5 = scmp.lt.s32.totalorder %s445_s27, %s445_s27 }
   0xc   :  { %p452_p6 = por %p451_p5, %p450_p4 }
   0xe   :  { %p453_p7 = pnand %p452_p6, %p446_p3 }
  0x10   :  { %456 = shalt.err (!%p453_p7)
}
  0x11   :  { %s530_s28 = smov 64   ;;  %s531_s29 = smov 4  }
  0x12   :  { %36 = dma.hbm_to_vmem [thread:$0]  %s636_s1, 1024, %s31_s19, [#allocation6], %s530_s28, %s530_s28, %s531_s29  }
  0x13   :  { %s532_s7 = smov [#allocation2]   ;;  %s457_s11 = scalar_lea.hbm %s635_s0, 256 }
  0x14   :  { %s18_s8 = sshll.u32 %s532_s7, 4  ;;  %p458_p8 = scmp.ne.s32.totalorder %s635_s0, %s457_s11  ;;  %s19_s8 = int_to_ptr.vmem [resolvable:$true] %s18_s8 }
  0x15   :  { %p461_p9 = scmp.lt.u32.totalorder %s457_s11, %s635_s0 }
  0x17   :  { %p463_p10 = pnand %p461_p9, %p458_p8 }
  0x19   :  { %466 = shalt.err (!%p463_p10)
}
  0x1a   :  { %s467_s16 = scalar_lea.vmem %s19_s8, 256  ;;  %p472_p12 = scmp.lt.s32.totalorder %s19_s8, %s19_s8 }
  0x1b   :  { %p468_p11 = scmp.ne.s32.totalorder %s19_s8, %s467_s16  ;;  %p473_p13 = scmp.lt.s32.totalorder %s467_s16, %s467_s16 }
  0x1d   :  { %p474_p0 = por %p473_p13, %p472_p12 }
  0x1f   :  { %p475_p1 = pnand %p474_p0, %p468_p11 }
  0x21   :  { %478 = shalt.err (!%p475_p1)
}
  0x22   :  { %s533_s1 = smov 128   ;;  %s534_s17 = smov 8  }
  0x23   :  { %24 = dma.hbm_to_vmem [thread:$0]  %s635_s0, 256, %s19_s8, [#allocation3], %s533_s1, %s533_s1, %s534_s17  }
  0x24   :  { %s535_s20 = smov [#allocation7]   ;;  %s479_s24 = scalar_lea.hbm %s638_s3, 1024 }
  0x25   :  { %s44_s21 = sshll.u32 %s535_s20, 4  ;;  %p480_p2 = scmp.ne.s32.totalorder %s638_s3, %s479_s24  ;;  %s45_s21 = int_to_ptr.vmem [resolvable:$true] %s44_s21 }
  0x26   :  { %p483_p3 = scmp.lt.u32.totalorder %s479_s24, %s638_s3 }
  0x28   :  { %p485_p4 = pnand %p483_p3, %p480_p2 }
  0x2a   :  { %488 = shalt.err (!%p485_p4)
}
  0x2b   :  { %s489_s6 = scalar_lea.vmem %s45_s21, 1024  ;;  %p494_p6 = scmp.lt.s32.totalorder %s45_s21, %s45_s21 }
  0x2c   :  { %p490_p5 = scmp.ne.s32.totalorder %s45_s21, %s489_s6  ;;  %p495_p7 = scmp.lt.s32.totalorder %s489_s6, %s489_s6 }
  0x2e   :  { %p496_p8 = por %p495_p7, %p494_p6 }
  0x30   :  { %p497_p9 = pnand %p496_p8, %p490_p5 }
  0x32   :  { %500 = shalt.err (!%p497_p9)
}
  0x33   :  { %50 = dma.hbm_to_vmem [thread:$0]  %s638_s3, 1024, %s45_s21, [#allocation6], %s530_s28, %s530_s28, %s531_s29  }
  0x34   :  { %523 = dma.done.wait [#allocation3], 256  }
  0x35   :  { %524 = vsyncadd [#allocation3], 4294967040 }
  0x36   :  { %525 = dma.done.wait [#allocation6], 2048  }
  0x37   :  { %526 = vsyncadd [#allocation6], 4294965248  ;;  %v536_v0 = vmov 0.0   ;;  %vm537_vm0 = vmmov 0   ;;  %v411_v1 = vld [vmem:[#allocation5] sm:$0xff]   ;;  %v412_v2 = vld [vmem:[#allocation5 + $0x8] sm:$0xff]  }
  0x38   :  { %361 = vmatprep.subr.bf16.mxu0 %v536_v0  ;;  %377 = vmatprep.mubr.msk.bf16.mxu0 %vm537_vm0, %v536_v0  ;;  %v413_v3 = vld [vmem:[#allocation5 + $0x10] sm:$0xff]   ;;  %v419_v4 = vld [vmem:[#allocation7] sm:$0xff]   ;;  %v414_v5 = vld [vmem:[#allocation5 + $0x18] sm:$0xff]  }
  0x39   :  { %381 = vmatprep.subr.bf16.mxu1 %v536_v0  ;;  %397 = vmatprep.mubr.msk.bf16.mxu1 %vm537_vm0, %v536_v0  ;;  %v420_v6 = vld [vmem:[#allocation7 + $0x8] sm:$0xff]   ;;  %v415_v7 = vld [vmem:[#allocation5 + $0x20] sm:$0xff]   ;;  %v421_v8 = vld [vmem:[#allocation7 + $0x10] sm:$0xff]  }
  0x3a   :  { %362 = vmatpush3.bf16.msra.mxu0 %v411_v1  ;;  %382 = vmatpush3.bf16.msra.mxu1 %v419_v4  ;;  %v416_v9 = vld [vmem:[#allocation5 + $0x28] sm:$0xff]   ;;  %v422_v10 = vld [vmem:[#allocation7 + $0x18] sm:$0xff]   ;;  %v417_v11 = vld [vmem:[#allocation5 + $0x30] sm:$0xff]  }
  0x3b   :  { %363 = vmatprep.subr.bf16.mxu0 %v536_v0  ;;  %383 = vmatprep.subr.bf16.mxu1 %v536_v0  ;;  %v423_v12 = vld [vmem:[#allocation7 + $0x20] sm:$0xff]   ;;  %v418_v13 = vld [vmem:[#allocation5 + $0x38] sm:$0xff]   ;;  %v63_v14 = vld [vmem:[#allocation2] sm:$0xff] }
  0x3c   :  { %v64_v15 = vld [vmem:[#allocation2 + $0x8] sm:$0xff]  ;;  %v424_v16 = vld [vmem:[#allocation7 + $0x28] sm:$0xff]   ;;  %v425_v18 = vld [vmem:[#allocation7 + $0x30] sm:$0xff]  }
  0x3d   :  { %v65_v17 = vpack.c.bf16 %v64_v15, %v63_v14  ;;  %v426_v19 = vld [vmem:[#allocation7 + $0x38] sm:$0xff]   ;;  %v325_v20 = vld [vmem:[%s637_s2] ss:$0 sm:$0xff]  ;;  %s538_s2 = smov [#allocation8]  }
  0x3e   :  { %364 = vmatpush3.bf16.msra.mxu0 %v412_v2  ;;  %384 = vmatpush3.bf16.msra.mxu1 %v420_v6  ;;  %v334_v30 = vld [vmem:[%s639_s4] ss:$0 sm:$0xff]  ;;  %s312_s4 = sshll.u32 %s538_s2, 4  ;;  %s313_s4 = int_to_ptr.vmem [resolvable:$true] %s312_s4 }
  0x3f   :  { %365 = vmatprep.subr.bf16.mxu0 %v536_v0  ;;  %385 = vmatprep.subr.bf16.mxu1 %v536_v0  ;;  %s501_s9 = scalar_lea.vmem %s313_s4, 256  ;;  %p506_p11 = scmp.lt.s32.totalorder %s313_s4, %s313_s4 }
  0x40   :  { %p502_p10 = scmp.ne.s32.totalorder %s313_s4, %s501_s9  ;;  %p507_p12 = scmp.lt.s32.totalorder %s501_s9, %s501_s9 }
  0x42   :  { %366 = vmatpush3.bf16.msra.mxu0 %v413_v3  ;;  %386 = vmatpush3.bf16.msra.mxu1 %v421_v8  ;;  %p508_p13 = por %p507_p12, %p506_p11 }
  0x43   :  { %367 = vmatprep.subr.bf16.mxu0 %v536_v0  ;;  %387 = vmatprep.subr.bf16.mxu1 %v536_v0 }
  0x44   :  { %p509_p0 = pnand %p508_p13, %p502_p10 }
  0x46   :  { %368 = vmatpush3.bf16.msra.mxu0 %v414_v5  ;;  %388 = vmatpush3.bf16.msra.mxu1 %v422_v10 }
  0x47   :  { %369 = vmatprep.subr.bf16.mxu0 %v536_v0  ;;  %389 = vmatprep.subr.bf16.mxu1 %v536_v0 }
  0x4a   :  { %370 = vmatpush3.bf16.msra.mxu0 %v415_v7  ;;  %390 = vmatpush3.bf16.msra.mxu1 %v423_v12 }
  0x4b   :  { %371 = vmatprep.subr.bf16.mxu0 %v536_v0  ;;  %391 = vmatprep.subr.bf16.mxu1 %v536_v0 }
  0x4e   :  { %372 = vmatpush3.bf16.msra.mxu0 %v416_v9  ;;  %392 = vmatpush3.bf16.msra.mxu1 %v424_v16 }
  0x4f   :  { %373 = vmatprep.subr.bf16.mxu0 %v536_v0  ;;  %393 = vmatprep.subr.bf16.mxu1 %v536_v0 }
  0x52   :  { %374 = vmatpush3.bf16.msra.mxu0 %v417_v11  ;;  %394 = vmatpush3.bf16.msra.mxu1 %v425_v18 }
  0x53   :  { %375 = vmatprep.subr.bf16.mxu0 %v536_v0  ;;  %395 = vmatprep.subr.bf16.mxu1 %v536_v0 }
  0x56   :  { %376 = vmatpush3.bf16.msra.mxu0 %v418_v13  ;;  %396 = vmatpush3.bf16.msra.mxu1 %v426_v19 }
  0x59   :  { %378 = vmatmul.mubr.bf16.vlgmr.msra.gmra.mrb[0].mxu0 %v65_v17 }
 0x12c   :  { %v171_v21 = vpop.f32.mrb[0].mxu0 }
 0x12d   :  { %v172_v22 = vadd.f32 %v325_v20, %v171_v21  ;;  %v379_v23 = vpop.f32.mrb[1].mxu0 }
 0x12e   :  { %v174_v24 = vpop.f32.mrb[2].mxu0 }
 0x12f   :  { %v175_v25 = vadd.f32 %v325_v20, %v174_v24  ;;  %v380_v26 = vpop.f32.mrb[3].mxu0  ;;  %v178_v27 = vmax.f32 %v172_v22, 0.0 }
 0x131   :  { %v179_v28 = vmax.f32 %v175_v25, 0.0 }
 0x133   :  { %v180_v29 = vpack.c.bf16 %v179_v28, %v178_v27 }
 0x135   :  { %398 = vmatmul.mubr.bf16.vlgmr.msra.gmra.mrb[0].mxu1 %v180_v29 }
 0x208   :  { %v286_v31 = vpop.f32.mrb[0].mxu1 }
 0x209   :  { %v287_v32 = vadd.f32 %v334_v30, %v286_v31  ;;  %v399_v33 = vpop.f32.mrb[1].mxu1 }
 0x20a   :  { %v289_v34 = vpop.f32.mrb[2].mxu1 }
 0x20b   :  { %v293_v35 = vsub.f32 0.0, %v287_v32  ;;  %v290_v36 = vadd.f32 %v334_v30, %v289_v34  ;;  %v400_v37 = vpop.f32.mrb[3].mxu1 }
 0x20d   :  { %v295_v38 = vmul.f32 1.442695, %v293_v35  ;;  %v294_v39 = vsub.f32 0.0, %v290_v36 }
 0x20f   :  { %427 = vpow2.f32 %v295_v38  ;;  %v297_v40 = vmul.f32 1.442695, %v294_v39 }
 0x211   :  { %429 = vpow2.f32 %v297_v40 }
 0x219   :  { %v428_v41 = vpop.eup %427 }
 0x21a   :  { %v299_v42 = vadd.f32 1.0, %v428_v41 }
 0x21b   :  { %v430_v43 = vpop.eup %429 }
 0x21c   :  { %431 = vrcp.f32 %v299_v42  ;;  %v300_v44 = vadd.f32 1.0, %v430_v43 }
 0x21e   :  { %433 = vrcp.f32 %v300_v44 }
 0x226   :  { %v432_v45 = vpop.eup %431 }
 0x227   :  { %305 = vst [vmem:[#allocation8] sm:$0xff] %v432_v45 }
 0x228   :  { %v434_v46 = vpop.eup %433 }
 0x229   :  { %306 = vst [vmem:[#allocation8 + $0x8] sm:$0xff] %v434_v46 }
 0x22a   :  { %512 = shalt.err (!%p509_p0)
}
 0x22b   :  { %s513_s12 = scalar_lea.hbm %s640_s5, 256 }
 0x22c   :  { %p514_p1 = scmp.ne.s32.totalorder %s640_s5, %s513_s12  ;;  %p517_p2 = scmp.lt.u32.totalorder %s513_s12, %s640_s5 }
 0x22e   :  { %p519_p3 = pnand %p517_p2, %p514_p1 }
 0x230   :  { %522 = shalt.err (!%p519_p3)
}
 0x231   :  { %318 = dma.vmem_to_hbm [thread:$0]  %s313_s4, 256, %s640_s5, [#allocation4], %s533_s1, %s533_s1, %s534_s17  }
 0x232   :  { %527 = dma.done.wait [#allocation4], 256  }
 0x233   :  { %528 = vsyncadd [#allocation4], 4294967040 }
 0x234   :  { %322 = vsyncpa [#allocation3], 1 }
 0x235   :  { %323 = vsyncpa [#allocation6], 1 }
 0x236   :  { %324 = vsyncpa [#allocation4], 1 }

</bundles_post_ra>
